<compile_context>
chip_gen: v5e
topology: v5e:2x2
jax: 0.10.0
libtpu: 0.0.40
codegen_flags: <defaults>
</compile_context>

<pallas_src>
import functools

import jax
import jax.numpy as jnp
import numpy as np
from jax.experimental import pallas as pl
from jax.experimental.pallas import tpu as pltpu


def _round_up(n, m):
    return ((n + m - 1) // m) * m


def _cdiv(a, b):
    return (a + b - 1) // b


def _act(name, x):
    if name == "relu":
        return jnp.maximum(x, 0.0)
    if name == "sigmoid":
        return jax.nn.sigmoid(x)
    if name == "tanh":
        return jnp.tanh(x)
    if name == "identity":
        return x
    raise ValueError(f"Unknown activation function: {name}")


# ----------------------------- kernel ---------------------------------------


def mlp_kernel(*refs, n_hidden, activation, final_activation):
    if n_hidden > 0:
        (x_ref, w_in_ref, b_in_ref, wh_ref, bh_ref,
         w_out_ref, b_out_ref, o_ref) = refs
    else:
        x_ref, w_in_ref, b_in_ref, w_out_ref, b_out_ref, o_ref = refs
        wh_ref = bh_ref = None

    # Input layer: (TB, IN_P) @ (IN_P, H_P) — bf16 operands straight from VMEM,
    # f32 MXU accumulation; bias add + activation in f32 on the VPU.
    h = jnp.dot(x_ref[...], w_in_ref[...],
                preferred_element_type=jnp.float32) + b_in_ref[...]
    h = _act(activation, h)

    # Hidden layers (statically unrolled; n_hidden is small for this module).
    # TODO(synk): on v6e/v7x the epilogue (bias + act) could stay in bf16 to
    # halve VPU/EUP work; kept in f32 so one kernel is also v5e-safe.
    for l in range(n_hidden):
        h = jnp.dot(h.astype(jnp.bfloat16), wh_ref[l],
                    preferred_element_type=jnp.float32) + bh_ref[l]
        h = _act(activation, h)

    # Output layer + final activation; lane-dense (TB, OUT_P) f32 store.
    out = jnp.dot(h.astype(jnp.bfloat16), w_out_ref[...],
                  preferred_element_type=jnp.float32) + b_out_ref[...]
    o_ref[...] = _act(final_activation, out)


# --------------------------- parameter prep ---------------------------------


def init_params(key, input_dim, output_dim, hidden_size, hidden_layers):
    """PyTorch-convention params: Linear weight (out_f, in_f), bias (out_f,)."""
    ks = jax.random.split(key, 5)

    def lin(kw, kb, out_f, in_f):
        bound = 1.0 / np.sqrt(in_f)
        w = jax.random.uniform(kw, (out_f, in_f), jnp.float32, -bound, bound)
        b = jax.random.uniform(kb, (out_f,), jnp.float32, -bound, bound)
        return w, b

    w_in, b_in = lin(ks[0], ks[1], hidden_size, input_dim)
    wh, bh = [], []
    if hidden_layers > 0:
        hk = jax.random.split(ks[2], 2 * hidden_layers)
        for l in range(hidden_layers):
            w, b = lin(hk[2 * l], hk[2 * l + 1], hidden_size, hidden_size)
            wh.append(w)
            bh.append(b)
    w_out, b_out = lin(ks[3], ks[4], output_dim, hidden_size)
    return dict(w_in=w_in, b_in=b_in, wh=wh, bh=bh, w_out=w_out, b_out=b_out)


def _pad2d(a, rows, cols):
    return jnp.pad(a, ((0, rows - a.shape[0]), (0, cols - a.shape[1])))


def prepare_params(params, input_dim, output_dim, hidden_size, hidden_layers):
    """Transpose to (in_f, out_f), zero-pad feature dims to 128, cast weights to bf16."""
    in_p = _round_up(input_dim, 128)
    h_p = _round_up(hidden_size, 128)
    out_p = _round_up(output_dim, 128)

    w_in_t = _pad2d(params["w_in"].T, in_p, h_p).astype(jnp.bfloat16)
    b_in = jnp.pad(params["b_in"], (0, h_p - hidden_size)).reshape(1, h_p)
    w_out_t = _pad2d(params["w_out"].T, h_p, out_p).astype(jnp.bfloat16)
    b_out = jnp.pad(params["b_out"], (0, out_p - output_dim)).reshape(1, out_p)

    prep = dict(w_in_t=w_in_t, b_in=b_in, w_out_t=w_out_t, b_out=b_out,
                in_p=in_p, h_p=h_p, out_p=out_p,
                input_dim=input_dim, output_dim=output_dim)
    if hidden_layers > 0:
        prep["wh_t"] = jnp.stack(
            [_pad2d(w.T, h_p, h_p) for w in params["wh"]]).astype(jnp.bfloat16)
        prep["bh"] = jnp.stack(
            [jnp.pad(b, (0, h_p - hidden_size)).reshape(1, h_p)
             for b in params["bh"]])
    return prep


# ------------------------------ wrapper --------------------------------------


def mlp_forward(x, prep, *, hidden_layers, activation, final_activation,
                batch_tile=512):
    B, input_dim = x.shape
    in_p, h_p, out_p = prep["in_p"], prep["h_p"], prep["out_p"]
    out_dim = prep["output_dim"]
    n_hidden = hidden_layers

    # --- batch tiling ---------------------------------------------------
    # Choose the number of tiles first so the padded batch never exceeds B by
    # more than one tile, then force >= 2 tiles (when B is big enough) so both
    # v7x TensorCores get work under dimension_semantics=("parallel",).
    n_tiles = max(1, _cdiv(B, batch_tile))
    if n_tiles < 2 and B > 16:
        n_tiles = 2
    TB = _round_up(_cdiv(B, n_tiles), 16)          # multiple of 16: bf16 rows
    b_pad = TB * n_tiles
    grid = (n_tiles,)

    # Pad (only if needed) and cast once in the wrapper -> bf16 input stream.
    if b_pad == B and in_p == input_dim:
        xp = x.astype(jnp.bfloat16)
    else:
        xp = jnp.pad(x, ((0, b_pad - B), (0, in_p - input_dim))
                     ).astype(jnp.bfloat16)

    # --- arguments + specs ------------------------------------------------
    args = [xp, prep["w_in_t"], prep["b_in"]]
    if n_hidden > 0:
        args += [prep["wh_t"], prep["bh"]]
    args += [prep["w_out_t"], prep["b_out"]]

    def build_specs(single_buffer_weights):
        def const_spec(shape):
            idx = lambda i, _s=shape: (0,) * len(_s)
            if single_buffer_weights:
                # Block index never changes -> one resident buffer is enough.
                return pl.BlockSpec(shape, idx, pipeline_mode=pl.Buffered(1))
            return pl.BlockSpec(shape, idx)

        in_specs = [
            pl.BlockSpec((TB, in_p), lambda i: (i, 0)),   # x: streamed per tile
            const_spec((in_p, h_p)),                      # weights: VMEM-resident
            const_spec((1, h_p)),
        ]
        if n_hidden > 0:
            in_specs += [const_spec((n_hidden, h_p, h_p)),
                         const_spec((n_hidden, 1, h_p))]
        in_specs += [const_spec((h_p, out_p)), const_spec((1, out_p))]
        return in_specs

    # --- VMEM budget (per-generation cap) ---------------------------------
    weight_bytes = 2 * (in_p * h_p + n_hidden * h_p * h_p + h_p * out_p)  # bf16
    io_bytes = 2 * TB * in_p * 2 + 2 * TB * out_p * 4    # 2-buffered x (bf16) + out (f32)
    live_bytes = 2 * TB * h_p * 4                        # live f32 hidden tile + spill headroom
    try:
        vmem_cap = pltpu.get_tpu_info().vmem_capacity_bytes
    except Exception:
        vmem_cap = 64 << 20                              # conservative (v7x per-TC)
    vmem_limit = int(min(int(0.75 * vmem_cap),
                         max(32 << 20,
                             2 * (weight_bytes + io_bytes + live_bytes))))
    # TODO(synk): if weight_bytes alone approaches the v7x budget (~24-28 MiB),
    # stream per-layer (H,H) weight slabs over an inner 'arbitrary' grid axis
    # (h kept in VMEM scratch, pl.when-gated first/last layers) instead of
    # holding the full stack resident.

    # --- cost estimate -----------------------------------------------------
    flops = 2 * b_pad * (in_p * h_p + n_hidden * h_p * h_p + h_p * out_p)
    transc = {"relu": 0, "identity": 0, "sigmoid": 1, "tanh": 1}
    transcendentals = (b_pad * h_p * (n_hidden + 1) * transc[activation]
                       + b_pad * out_p * transc[final_activation])
    bytes_accessed = weight_bytes + b_pad * in_p * 2 + b_pad * out_p * 4
    cost = pl.CostEstimate(flops=flops, transcendentals=transcendentals,
                           bytes_accessed=bytes_accessed)

    kernel = functools.partial(mlp_kernel, n_hidden=n_hidden,
                               activation=activation,
                               final_activation=final_activation)

    def run(single_buffer_weights):
        return pl.pallas_call(
            kernel,
            out_shape=jax.ShapeDtypeStruct((b_pad, out_p), jnp.float32),
            grid=grid,
            in_specs=build_specs(single_buffer_weights),
            out_specs=pl.BlockSpec((TB, out_p), lambda i: (i, 0)),
            compiler_params=pltpu.CompilerParams(
                dimension_semantics=("parallel",),
                vmem_limit_bytes=vmem_limit),
            cost_estimate=cost,
        )(*args)

    try:
        out = run(single_buffer_weights=True)
    except Exception:
        # Fallback: default (double) buffering on the constant specs if the
        # backend rejects pl.Buffered(1); identical numerics, known-good path.
        out = run(single_buffer_weights=False)

    if b_pad == B and out_p == out_dim:
        return out
    return out[:B, :out_dim]


# ----------------------------- reference -------------------------------------


def mlp_reference(x, params, *, hidden_layers, activation, final_activation):
    """Pure-JAX reference with the same bf16 weight/activation quantization."""
    def lin(h, w, b):
        wq = w.astype(jnp.bfloat16).astype(jnp.float32)
        hq = h.astype(jnp.bfloat16).astype(jnp.float32)
        return hq @ wq.T + b

    h = _act(activation, lin(x, params["w_in"], params["b_in"]))
    for l in range(hidden_layers):
        h = _act(activation, lin(h, params["wh"][l], params["bh"][l]))
    return _act(final_activation, lin(h, params["w_out"], params["b_out"]))


# -------------------------------- main ----------------------------------------


if __name__ == "__main__":
    # NeuralNetwork(input_dim=16, output_dim=8, hidden_size=32,
    #               hidden_layers=2, activation='relu', final_activation='tanh')
    input_dim, output_dim, hidden_size, hidden_layers = 16, 8, 32, 2
    activation, final_activation = "relu", "tanh"
    batch = 4

    key = jax.random.PRNGKey(0)
    kx, kp = jax.random.split(key)
    x = jax.random.normal(kx, (batch, input_dim), jnp.float32)
    params = init_params(kp, input_dim, output_dim, hidden_size, hidden_layers)
    prep = prepare_params(params, input_dim, output_dim, hidden_size,
                          hidden_layers)

    out = mlp_forward(x, prep,
                      hidden_layers=hidden_layers,
                      activation=activation,
                      final_activation=final_activation)
    out = jax.block_until_ready(out)

    ref = mlp_reference(x, params,
                        hidden_layers=hidden_layers,
                        activation=activation,
                        final_activation=final_activation)
    np.testing.assert_allclose(np.asarray(out), np.asarray(ref),
                               rtol=5e-3, atol=5e-3)
    print("KERNEL_OK")
</pallas_src>

<mosaic_0001>
module attributes {stable_mosaic.version = 11 : i64} {
  func.func @mlp_kernel(%arg0: i32, %arg1: memref<16x128xbf16, #tpu.memory_space<vmem>>, %arg2: memref<128x128xbf16, #tpu.memory_space<vmem>>, %arg3: memref<1x128xf32, #tpu.memory_space<vmem>>, %arg4: memref<2x128x128xbf16, #tpu.memory_space<vmem>>, %arg5: memref<2x1x128xf32, #tpu.memory_space<vmem>>, %arg6: memref<128x128xbf16, #tpu.memory_space<vmem>>, %arg7: memref<1x128xf32, #tpu.memory_space<vmem>>, %arg8: memref<16x128xf32, #tpu.memory_space<vmem>>) attributes {dimension_semantics = [#tpu.dimension_semantics<parallel>], iteration_bounds = array<i64: 1>, scalar_prefetch = 0 : i64, scratch_operands = 0 : i64, tpu.core_type = #tpu.core_type<tc>, window_params = [{transform_indices = @transform_0, window_bounds = array<i64: 16, 128>}, {pipeline_mode = #tpu.pipeline_mode<synchronous>, transform_indices = @transform_1, window_bounds = array<i64: 128, 128>}, {pipeline_mode = #tpu.pipeline_mode<synchronous>, transform_indices = @transform_2, window_bounds = array<i64: 1, 128>}, {pipeline_mode = #tpu.pipeline_mode<synchronous>, transform_indices = @transform_3, window_bounds = array<i64: 2, 128, 128>}, {pipeline_mode = #tpu.pipeline_mode<synchronous>, transform_indices = @transform_4, window_bounds = array<i64: 2, 1, 128>}, {pipeline_mode = #tpu.pipeline_mode<synchronous>, transform_indices = @transform_5, window_bounds = array<i64: 128, 128>}, {pipeline_mode = #tpu.pipeline_mode<synchronous>, transform_indices = @transform_6, window_bounds = array<i64: 1, 128>}, {transform_indices = @transform_7, window_bounds = array<i64: 16, 128>}]} {
    %c0 = arith.constant 0 : index
    %c0_0 = arith.constant 0 : index
    %0 = vector.load %arg1[%c0, %c0_0] : memref<16x128xbf16, #tpu.memory_space<vmem>>, vector<16x128xbf16>
    %c0_1 = arith.constant 0 : index
    %c0_2 = arith.constant 0 : index
    %1 = vector.load %arg2[%c0_1, %c0_2] : memref<128x128xbf16, #tpu.memory_space<vmem>>, vector<128x128xbf16>
    %cst = arith.constant dense<0.000000e+00> : vector<16x128xf32>
    %2 = tpu.matmul %0, %1, %cst {dimension_numbers = #tpu.dot_dimension_numbers<[1], [0], [0], [1], [0, 0, 1, 1], [], []>} : vector<16x128xbf16>, vector<128x128xbf16>, vector<16x128xf32> -> vector<16x128xf32>
    %c0_3 = arith.constant 0 : index
    %c0_4 = arith.constant 0 : index
    %3 = vector.load %arg3[%c0_3, %c0_4] : memref<1x128xf32, #tpu.memory_space<vmem>>, vector<1x128xf32>
    %4 = vector.broadcast %3 : vector<1x128xf32> to vector<16x128xf32>
    %5 = arith.addf %2, %4 : vector<16x128xf32>
    %cst_5 = arith.constant 0.000000e+00 : f32
    %6 = vector.broadcast %cst_5 : f32 to vector<16x128xf32>
    %7 = arith.maximumf %5, %6 : vector<16x128xf32>
    %8 = arith.truncf %7 : vector<16x128xf32> to vector<16x128xbf16>
    %c0_6 = arith.constant 0 : index
    %c0_7 = arith.constant 0 : index
    %c0_8 = arith.constant 0 : index
    %9 = vector.load %arg4[%c0_6, %c0_7, %c0_8] : memref<2x128x128xbf16, #tpu.memory_space<vmem>>, vector<1x128x128xbf16>
    %10 = vector.shape_cast %9 : vector<1x128x128xbf16> to vector<128x128xbf16>
    %cst_9 = arith.constant dense<0.000000e+00> : vector<16x128xf32>
    %11 = tpu.matmul %8, %10, %cst_9 {dimension_numbers = #tpu.dot_dimension_numbers<[1], [0], [0], [1], [0, 0, 1, 1], [], []>} : vector<16x128xbf16>, vector<128x128xbf16>, vector<16x128xf32> -> vector<16x128xf32>
    %c0_10 = arith.constant 0 : index
    %c0_11 = arith.constant 0 : index
    %c0_12 = arith.constant 0 : index
    %12 = vector.load %arg5[%c0_10, %c0_11, %c0_12] : memref<2x1x128xf32, #tpu.memory_space<vmem>>, vector<1x1x128xf32>
    %13 = vector.shape_cast %12 : vector<1x1x128xf32> to vector<1x128xf32>
    %14 = vector.broadcast %13 : vector<1x128xf32> to vector<16x128xf32>
    %15 = arith.addf %11, %14 : vector<16x128xf32>
    %cst_13 = arith.constant 0.000000e+00 : f32
    %16 = vector.broadcast %cst_13 : f32 to vector<16x128xf32>
    %17 = arith.maximumf %15, %16 : vector<16x128xf32>
    %18 = arith.truncf %17 : vector<16x128xf32> to vector<16x128xbf16>
    %c1 = arith.constant 1 : index
    %c0_14 = arith.constant 0 : index
    %c0_15 = arith.constant 0 : index
    %19 = vector.load %arg4[%c1, %c0_14, %c0_15] : memref<2x128x128xbf16, #tpu.memory_space<vmem>>, vector<1x128x128xbf16>
    %20 = vector.shape_cast %19 : vector<1x128x128xbf16> to vector<128x128xbf16>
    %cst_16 = arith.constant dense<0.000000e+00> : vector<16x128xf32>
    %21 = tpu.matmul %18, %20, %cst_16 {dimension_numbers = #tpu.dot_dimension_numbers<[1], [0], [0], [1], [0, 0, 1, 1], [], []>} : vector<16x128xbf16>, vector<128x128xbf16>, vector<16x128xf32> -> vector<16x128xf32>
    %c1_17 = arith.constant 1 : index
    %c0_18 = arith.constant 0 : index
    %c0_19 = arith.constant 0 : index
    %22 = vector.load %arg5[%c1_17, %c0_18, %c0_19] : memref<2x1x128xf32, #tpu.memory_space<vmem>>, vector<1x1x128xf32>
    %23 = vector.shape_cast %22 : vector<1x1x128xf32> to vector<1x128xf32>
    %24 = vector.broadcast %23 : vector<1x128xf32> to vector<16x128xf32>
    %25 = arith.addf %21, %24 : vector<16x128xf32>
    %cst_20 = arith.constant 0.000000e+00 : f32
    %26 = vector.broadcast %cst_20 : f32 to vector<16x128xf32>
    %27 = arith.maximumf %25, %26 : vector<16x128xf32>
    %28 = arith.truncf %27 : vector<16x128xf32> to vector<16x128xbf16>
    %c0_21 = arith.constant 0 : index
    %c0_22 = arith.constant 0 : index
    %29 = vector.load %arg6[%c0_21, %c0_22] : memref<128x128xbf16, #tpu.memory_space<vmem>>, vector<128x128xbf16>
    %cst_23 = arith.constant dense<0.000000e+00> : vector<16x128xf32>
    %30 = tpu.matmul %28, %29, %cst_23 {dimension_numbers = #tpu.dot_dimension_numbers<[1], [0], [0], [1], [0, 0, 1, 1], [], []>} : vector<16x128xbf16>, vector<128x128xbf16>, vector<16x128xf32> -> vector<16x128xf32>
    %c0_24 = arith.constant 0 : index
    %c0_25 = arith.constant 0 : index
    %31 = vector.load %arg7[%c0_24, %c0_25] : memref<1x128xf32, #tpu.memory_space<vmem>>, vector<1x128xf32>
    %32 = vector.broadcast %31 : vector<1x128xf32> to vector<16x128xf32>
    %33 = arith.addf %30, %32 : vector<16x128xf32>
    %34 = math.tanh %33 : vector<16x128xf32>
    %c0_26 = arith.constant 0 : index
    %c0_27 = arith.constant 0 : index
    %35 = vector.load %arg8[%c0_26, %c0_27] : memref<16x128xf32, #tpu.memory_space<vmem>>, vector<16x128xf32>
    tpu.vector_store %arg8[%c0_26, %c0_27], %34 {strides = array<i32>} : memref<16x128xf32, #tpu.memory_space<vmem>>, vector<16x128xf32>,
    return
  }
  func.func @transform_0(%arg0: i32) -> (i32, i32) {
    %c0_i32 = arith.constant 0 : i32
    %c0_i32_0 = arith.constant 0 : i32
    return %arg0, %c0_i32 : i32, i32
  }
  func.func @transform_1(%arg0: i32) -> (i32, i32) {
    %c0_i32 = arith.constant 0 : i32
    %c0_i32_0 = arith.constant 0 : i32
    %c0_i32_1 = arith.constant 0 : i32
    return %c0_i32, %c0_i32_0 : i32, i32
  }
  func.func @transform_2(%arg0: i32) -> (i32, i32) {
    %c0_i32 = arith.constant 0 : i32
    %c0_i32_0 = arith.constant 0 : i32
    %c0_i32_1 = arith.constant 0 : i32
    return %c0_i32, %c0_i32_0 : i32, i32
  }
  func.func @transform_3(%arg0: i32) -> (i32, i32, i32) {
    %c0_i32 = arith.constant 0 : i32
    %c0_i32_0 = arith.constant 0 : i32
    %c0_i32_1 = arith.constant 0 : i32
    %c0_i32_2 = arith.constant 0 : i32
    return %c0_i32, %c0_i32_0, %c0_i32_1 : i32, i32, i32
  }
  func.func @transform_4(%arg0: i32) -> (i32, i32, i32) {
    %c0_i32 = arith.constant 0 : i32
    %c0_i32_0 = arith.constant 0 : i32
    %c0_i32_1 = arith.constant 0 : i32
    %c0_i32_2 = arith.constant 0 : i32
    return %c0_i32, %c0_i32_0, %c0_i32_1 : i32, i32, i32
  }
  func.func @transform_5(%arg0: i32) -> (i32, i32) {
    %c0_i32 = arith.constant 0 : i32
    %c0_i32_0 = arith.constant 0 : i32
    %c0_i32_1 = arith.constant 0 : i32
    return %c0_i32, %c0_i32_0 : i32, i32
  }
  func.func @transform_6(%arg0: i32) -> (i32, i32) {
    %c0_i32 = arith.constant 0 : i32
    %c0_i32_0 = arith.constant 0 : i32
    %c0_i32_1 = arith.constant 0 : i32
    return %c0_i32, %c0_i32_0 : i32, i32
  }
  func.func @transform_7(%arg0: i32) -> (i32, i32) {
    %c0_i32 = arith.constant 0 : i32
    %c0_i32_0 = arith.constant 0 : i32
    return %arg0, %c0_i32 : i32, i32
  }
}

module attributes {stable_mosaic.version = 11 : i64} {
  func.func @mlp_kernel(%arg0: i32, %arg1: memref<16x128xbf16, #tpu.memory_space<vmem>>, %arg2: memref<128x128xbf16, #tpu.memory_space<vmem>>, %arg3: memref<1x128xf32, #tpu.memory_space<vmem>>, %arg4: memref<2x128x128xbf16, #tpu.memory_space<vmem>>, %arg5: memref<2x1x128xf32, #tpu.memory_space<vmem>>, %arg6: memref<128x128xbf16, #tpu.memory_space<vmem>>, %arg7: memref<1x128xf32, #tpu.memory_space<vmem>>, %arg8: memref<16x128xf32, #tpu.memory_space<vmem>>) attributes {dimension_semantics = [#tpu.dimension_semantics<parallel>], iteration_bounds = array<i64: 1>, scalar_prefetch = 0 : i64, scratch_operands = 0 : i64, tpu.core_type = #tpu.core_type<tc>, window_params = [{transform_indices = @transform_0, window_bounds = array<i64: 16, 128>}, {pipeline_mode = #tpu.pipeline_mode<synchronous>, transform_indices = @transform_1, window_bounds = array<i64: 128, 128>}, {pipeline_mode = #tpu.pipeline_mode<synchronous>, transform_indices = @transform_2, window_bounds = array<i64: 1, 128>}, {pipeline_mode = #tpu.pipeline_mode<synchronous>, transform_indices = @transform_3, window_bounds = array<i64: 2, 128, 128>}, {pipeline_mode = #tpu.pipeline_mode<synchronous>, transform_indices = @transform_4, window_bounds = array<i64: 2, 1, 128>}, {pipeline_mode = #tpu.pipeline_mode<synchronous>, transform_indices = @transform_5, window_bounds = array<i64: 128, 128>}, {pipeline_mode = #tpu.pipeline_mode<synchronous>, transform_indices = @transform_6, window_bounds = array<i64: 1, 128>}, {transform_indices = @transform_7, window_bounds = array<i64: 16, 128>}]} {
    %c0 = arith.constant 0 : index
    %c0_0 = arith.constant 0 : index
    %0 = vector.load %arg1[%c0, %c0_0] : memref<16x128xbf16, #tpu.memory_space<vmem>>, vector<16x128xbf16>
    %c0_1 = arith.constant 0 : index
    %c0_2 = arith.constant 0 : index
    %1 = vector.load %arg2[%c0_1, %c0_2] : memref<128x128xbf16, #tpu.memory_space<vmem>>, vector<128x128xbf16>
    %cst = arith.constant dense<0.000000e+00> : vector<16x128xf32>
    %2 = tpu.matmul %0, %1, %cst {dimension_numbers = #tpu.dot_dimension_numbers<[1], [0], [0], [1], [0, 0, 1, 1], [], []>} : vector<16x128xbf16>, vector<128x128xbf16>, vector<16x128xf32> -> vector<16x128xf32>
    %c0_3 = arith.constant 0 : index
    %c0_4 = arith.constant 0 : index
    %3 = vector.load %arg3[%c0_3, %c0_4] : memref<1x128xf32, #tpu.memory_space<vmem>>, vector<1x128xf32>
    %4 = vector.broadcast %3 : vector<1x128xf32> to vector<16x128xf32>
    %5 = arith.addf %2, %4 : vector<16x128xf32>
    %cst_5 = arith.constant 0.000000e+00 : f32
    %6 = vector.broadcast %cst_5 : f32 to vector<16x128xf32>
    %7 = arith.maximumf %5, %6 : vector<16x128xf32>
    %8 = arith.truncf %7 : vector<16x128xf32> to vector<16x128xbf16>
    %c0_6 = arith.constant 0 : index
    %c0_7 = arith.constant 0 : index
    %c0_8 = arith.constant 0 : index
    %9 = vector.load %arg4[%c0_6, %c0_7, %c0_8] : memref<2x128x128xbf16, #tpu.memory_space<vmem>>, vector<1x128x128xbf16>
    %10 = vector.shape_cast %9 : vector<1x128x128xbf16> to vector<128x128xbf16>
    %cst_9 = arith.constant dense<0.000000e+00> : vector<16x128xf32>
    %11 = tpu.matmul %8, %10, %cst_9 {dimension_numbers = #tpu.dot_dimension_numbers<[1], [0], [0], [1], [0, 0, 1, 1], [], []>} : vector<16x128xbf16>, vector<128x128xbf16>, vector<16x128xf32> -> vector<16x128xf32>
    %c0_10 = arith.constant 0 : index
    %c0_11 = arith.constant 0 : index
    %c0_12 = arith.constant 0 : index
    %12 = vector.load %arg5[%c0_10, %c0_11, %c0_12] : memref<2x1x128xf32, #tpu.memory_space<vmem>>, vector<1x1x128xf32>
    %13 = vector.shape_cast %12 : vector<1x1x128xf32> to vector<1x128xf32>
    %14 = vector.broadcast %13 : vector<1x128xf32> to vector<16x128xf32>
    %15 = arith.addf %11, %14 : vector<16x128xf32>
    %cst_13 = arith.constant 0.000000e+00 : f32
    %16 = vector.broadcast %cst_13 : f32 to vector<16x128xf32>
    %17 = arith.maximumf %15, %16 : vector<16x128xf32>
    %18 = arith.truncf %17 : vector<16x128xf32> to vector<16x128xbf16>
    %c1 = arith.constant 1 : index
    %c0_14 = arith.constant 0 : index
    %c0_15 = arith.constant 0 : index
    %19 = vector.load %arg4[%c1, %c0_14, %c0_15] : memref<2x128x128xbf16, #tpu.memory_space<vmem>>, vector<1x128x128xbf16>
    %20 = vector.shape_cast %19 : vector<1x128x128xbf16> to vector<128x128xbf16>
    %cst_16 = arith.constant dense<0.000000e+00> : vector<16x128xf32>
    %21 = tpu.matmul %18, %20, %cst_16 {dimension_numbers = #tpu.dot_dimension_numbers<[1], [0], [0], [1], [0, 0, 1, 1], [], []>} : vector<16x128xbf16>, vector<128x128xbf16>, vector<16x128xf32> -> vector<16x128xf32>
    %c1_17 = arith.constant 1 : index
    %c0_18 = arith.constant 0 : index
    %c0_19 = arith.constant 0 : index
    %22 = vector.load %arg5[%c1_17, %c0_18, %c0_19] : memref<2x1x128xf32, #tpu.memory_space<vmem>>, vector<1x1x128xf32>
    %23 = vector.shape_cast %22 : vector<1x1x128xf32> to vector<1x128xf32>
    %24 = vector.broadcast %23 : vector<1x128xf32> to vector<16x128xf32>
    %25 = arith.addf %21, %24 : vector<16x128xf32>
    %cst_20 = arith.constant 0.000000e+00 : f32
    %26 = vector.broadcast %cst_20 : f32 to vector<16x128xf32>
    %27 = arith.maximumf %25, %26 : vector<16x128xf32>
    %28 = arith.truncf %27 : vector<16x128xf32> to vector<16x128xbf16>
    %c0_21 = arith.constant 0 : index
    %c0_22 = arith.constant 0 : index
    %29 = vector.load %arg6[%c0_21, %c0_22] : memref<128x128xbf16, #tpu.memory_space<vmem>>, vector<128x128xbf16>
    %cst_23 = arith.constant dense<0.000000e+00> : vector<16x128xf32>
    %30 = tpu.matmul %28, %29, %cst_23 {dimension_numbers = #tpu.dot_dimension_numbers<[1], [0], [0], [1], [0, 0, 1, 1], [], []>} : vector<16x128xbf16>, vector<128x128xbf16>, vector<16x128xf32> -> vector<16x128xf32>
    %c0_24 = arith.constant 0 : index
    %c0_25 = arith.constant 0 : index
    %31 = vector.load %arg7[%c0_24, %c0_25] : memref<1x128xf32, #tpu.memory_space<vmem>>, vector<1x128xf32>
    %32 = vector.broadcast %31 : vector<1x128xf32> to vector<16x128xf32>
    %33 = arith.addf %30, %32 : vector<16x128xf32>
    %34 = math.tanh %33 : vector<16x128xf32>
    %c0_26 = arith.constant 0 : index
    %c0_27 = arith.constant 0 : index
    %35 = vector.load %arg8[%c0_26, %c0_27] : memref<16x128xf32, #tpu.memory_space<vmem>>, vector<16x128xf32>
    tpu.vector_store %arg8[%c0_26, %c0_27], %34 {strides = array<i32>} : memref<16x128xf32, #tpu.memory_space<vmem>>, vector<16x128xf32>,
    return
  }
  func.func @transform_0(%arg0: i32) -> (i32, i32) {
    %c0_i32 = arith.constant 0 : i32
    %c0_i32_0 = arith.constant 0 : i32
    return %arg0, %c0_i32 : i32, i32
  }
  func.func @transform_1(%arg0: i32) -> (i32, i32) {
    %c0_i32 = arith.constant 0 : i32
    %c0_i32_0 = arith.constant 0 : i32
    %c0_i32_1 = arith.constant 0 : i32
    return %c0_i32, %c0_i32_0 : i32, i32
  }
  func.func @transform_2(%arg0: i32) -> (i32, i32) {
    %c0_i32 = arith.constant 0 : i32
    %c0_i32_0 = arith.constant 0 : i32
    %c0_i32_1 = arith.constant 0 : i32
    return %c0_i32, %c0_i32_0 : i32, i32
  }
  func.func @transform_3(%arg0: i32) -> (i32, i32, i32) {
    %c0_i32 = arith.constant 0 : i32
    %c0_i32_0 = arith.constant 0 : i32
    %c0_i32_1 = arith.constant 0 : i32
    %c0_i32_2 = arith.constant 0 : i32
    return %c0_i32, %c0_i32_0, %c0_i32_1 : i32, i32, i32
  }
  func.func @transform_4(%arg0: i32) -> (i32, i32, i32) {
    %c0_i32 = arith.constant 0 : i32
    %c0_i32_0 = arith.constant 0 : i32
    %c0_i32_1 = arith.constant 0 : i32
    %c0_i32_2 = arith.constant 0 : i32
    return %c0_i32, %c0_i32_0, %c0_i32_1 : i32, i32, i32
  }
  func.func @transform_5(%arg0: i32) -> (i32, i32) {
    %c0_i32 = arith.constant 0 : i32
    %c0_i32_0 = arith.constant 0 : i32
    %c0_i32_1 = arith.constant 0 : i32
    return %c0_i32, %c0_i32_0 : i32, i32
  }
  func.func @transform_6(%arg0: i32) -> (i32, i32) {
    %c0_i32 = arith.constant 0 : i32
    %c0_i32_0 = arith.constant 0 : i32
    %c0_i32_1 = arith.constant 0 : i32
    return %c0_i32, %c0_i32_0 : i32, i32
  }
  func.func @transform_7(%arg0: i32) -> (i32, i32) {
    %c0_i32 = arith.constant 0 : i32
    %c0_i32_0 = arith.constant 0 : i32
    return %arg0, %c0_i32 : i32, i32
  }
}

</mosaic_0001>

<bundles_post_ra>
// kernel: tpu_custom_call.1
= control target key start
LH: loop header
LB: loop body
LE: loop exit
PB: predicated region body
PF: predicated region fallthrough
CT: control target
= control target key end

     0   :  { %12 = vsyncpa [#allocation3], 0  ;;  %s849_s0 = inlined_call_operand.hbm [shape: bf16[16,128], index: 0, kind: input, shape index: {}]   ;;  %s850_s1 = inlined_call_operand.hbm [shape: bf16[128,128], index: 1, kind: input, shape index: {}]   ;;  %s851_s2 = inlined_call_operand.vmem [shape: f32[1,128], index: 2, kind: input, shape index: {}]   ;;  %s852_s3 = inlined_call_operand.hbm [shape: bf16[2,128,128], index: 3, kind: input, shape index: {}]   ;;  %s853_s4 = inlined_call_operand.vmem [shape: f32[2,1,128], index: 4, kind: input, shape index: {}]   ;;  %s854_s5 = inlined_call_operand.hbm [shape: bf16[128,128], index: 5, kind: input, shape index: {}]   ;;  %s855_s6 = inlined_call_operand.vmem [shape: f32[1,128], index: 6, kind: input, shape index: {}]   ;;  %s856_s7 = inlined_call_operand.hbm [shape: f32[16,128], index: 7, kind: output, shape index: {}]  }
   0x1   :  { %13 = vsyncpa [#allocation6], 0 }
   0x2   :  { %14 = vsyncpa [#allocation9], 0 }
   0x3   :  { %15 = vsyncpa [#allocation4], 0  ;;  %s33_s26 = sshll.u32 %s850_s1, 4  ;;  %s773_s27 = smov [#allocation5]   ;;  %s34_s26 = int_to_ptr.hbm [resolvable:$true] %s33_s26 }
   0x4   :  { %s35_s28 = sshll.u32 %s773_s27, 4  ;;  %s20_s8 = sshll.u32 %s849_s0, 4  ;;  %s36_s28 = int_to_ptr.vmem [resolvable:$true] %s35_s28  ;;  %s21_s8 = int_to_ptr.hbm [resolvable:$true] %s20_s8 }
   0x5   :  { %s774_s9 = smov 64   ;;  %s775_s10 = smov 4  }
   0x6   :  { %41 = dma.hbm_to_vmem [thread:$0]  %s34_s26, 1024, %s36_s28, [#allocation6], %s774_s9, %s774_s9, %s775_s10  }
   0x7   :  { %s776_s11 = smov [#allocation2]   ;;  %s48_s15 = sshll.u32 %s852_s3, 4  ;;  %s49_s15 = int_to_ptr.hbm [resolvable:$true] %s48_s15 }
   0x8   :  { %s22_s12 = sshll.u32 %s776_s11, 4  ;;  %s63_s17 = sshll.u32 %s854_s5, 4  ;;  %s23_s12 = int_to_ptr.vmem [resolvable:$true] %s22_s12  ;;  %s64_s17 = int_to_ptr.hbm [resolvable:$true] %s63_s17 }
   0x9   :  { %28 = dma.hbm_to_vmem [thread:$0]  %s21_s8, 128, %s23_s12, [#allocation3], %s774_s9, %s774_s9, %s775_s10  }
   0xa   :  { %s777_s18 = smov [#allocation7]   ;;  %s778_s0 = smov [#allocation8]  }
   0xb   :  { %s50_s19 = sshll.u32 %s777_s18, 4  ;;  %s65_s20 = sshll.u32 %s778_s0, 4  ;;  %s51_s19 = int_to_ptr.vmem [resolvable:$true] %s50_s19  ;;  %s66_s20 = int_to_ptr.vmem [resolvable:$true] %s65_s20 }
   0xc   :  { %56 = dma.hbm_to_vmem [thread:$0]  %s49_s15, 2048, %s51_s19, [#allocation6], %s774_s9, %s774_s9, %s775_s10  }
   0xd   :  { %71 = dma.hbm_to_vmem [thread:$0]  %s64_s17, 1024, %s66_s20, [#allocation9], %s774_s9, %s774_s9, %s775_s10  }
   0xe   :  { %765 = dma.done.wait [#allocation3], 128  }
   0xf   :  { %766 = vsyncadd [#allocation3], 4294967168 }
  0x10   :  { %767 = dma.done.wait [#allocation6], 3072  }
  0x11   :  { %768 = vsyncadd [#allocation6], 4294964224 }
  0x12   :  { %769 = dma.done.wait [#allocation9], 1024  }
  0x13   :  { %770 = vsyncadd [#allocation9], 4294966272  ;;  %v603_v0 = vld [vmem:[#allocation5 + $0x38] sm:$0xff]  ;;  %v602_v1 = vld [vmem:[#allocation5 + $0x30] sm:$0xff]  ;;  %s447_s29 = sshll.u32 %s856_s7, 4  ;;  %s780_s30 = smov 128   ;;  %s448_s29 = int_to_ptr.hbm [resolvable:$true] %s447_s29 }
  0x14   :  { %166 = vmatpush.bf16.msra.mxu0 %v603_v0  ;;  %v611_v2 = vld [vmem:[#allocation7 + $0x38] sm:$0xff]  ;;  %v610_v3 = vld [vmem:[#allocation7 + $0x30] sm:$0xff]  ;;  %v601_v4 = vld [vmem:[#allocation5 + $0x28] sm:$0xff] }
  0x15   :  { %251 = vmatpush.bf16.msra.mxu1 %v611_v2  ;;  %v609_v5 = vld [vmem:[#allocation7 + $0x28] sm:$0xff]  ;;  %v600_v6 = vld [vmem:[#allocation5 + $0x20] sm:$0xff]  ;;  %v599_v8 = vld [vmem:[#allocation5 + $0x18] sm:$0xff] }
  0x16   :  { %v608_v7 = vld [vmem:[#allocation7 + $0x20] sm:$0xff]  ;;  %v598_v9 = vld [vmem:[#allocation5 + $0x10] sm:$0xff]  ;;  %v597_v10 = vld [vmem:[#allocation5 + $0x8] sm:$0xff] }
  0x17   :  { %v596_v11 = vld [vmem:[#allocation5] sm:$0xff]  ;;  %v595_v12 = vld [vmem:[#allocation2] sm:$0xff]  ;;  %v606_v14 = vld [vmem:[#allocation7 + $0x10] sm:$0xff] }
  0x18   :  { %167 = vmatpush.bf16.msra.mxu0 %v602_v1  ;;  %v607_v13 = vld [vmem:[#allocation7 + $0x18] sm:$0xff]  ;;  %v605_v15 = vld [vmem:[#allocation7 + $0x8] sm:$0xff]  ;;  %v604_v16 = vld [vmem:[#allocation7] sm:$0xff] }
  0x19   :  { %252 = vmatpush.bf16.msra.mxu1 %v610_v3  ;;  %v619_v17 = vld [vmem:[#allocation7 + $0x78] sm:$0xff]  ;;  %v618_v18 = vld [vmem:[#allocation7 + $0x70] sm:$0xff]  ;;  %v617_v19 = vld [vmem:[#allocation7 + $0x68] sm:$0xff] }
  0x1a   :  { %338 = vmatpush.bf16.msra.mxu2 %v619_v17  ;;  %v616_v20 = vld [vmem:[#allocation7 + $0x60] sm:$0xff]  ;;  %v637_v22 = vld [vmem:[%s851_s2] ss:$0 sm:$0xff]  ;;  %v614_v30 = vld [vmem:[#allocation7 + $0x50] sm:$0xff] }
  0x1b   :  { %v615_v29 = vld [vmem:[#allocation7 + $0x58] sm:$0xff]  ;;  %v613_v31 = vld [vmem:[#allocation7 + $0x48] sm:$0xff]  ;;  %v612_v32 = vld [vmem:[#allocation7 + $0x40] sm:$0xff] }
  0x1c   :  { %168 = vmatpush.bf16.msra.mxu0 %v601_v4  ;;  %v627_v33 = vld [vmem:[#allocation8 + $0x38] sm:$0xff]  ;;  %v626_v34 = vld [vmem:[#allocation8 + $0x30] sm:$0xff]  ;;  %v625_v35 = vld [vmem:[#allocation8 + $0x28] sm:$0xff] }
  0x1d   :  { %253 = vmatpush.bf16.msra.mxu1 %v609_v5  ;;  %423 = vmatpush.bf16.msra.mxu3 %v627_v33  ;;  %v624_v36 = vld [vmem:[#allocation8 + $0x20] sm:$0xff]  ;;  %v638_v38 = vld [vmem:[%s853_s4] ss:$0 sm:$0xff]  ;;  %v622_v46 = vld [vmem:[#allocation8 + $0x10] sm:$0xff] }
  0x1e   :  { %339 = vmatpush.bf16.msra.mxu2 %v618_v18  ;;  %v623_v45 = vld [vmem:[#allocation8 + $0x18] sm:$0xff]  ;;  %v621_v47 = vld [vmem:[#allocation8 + $0x8] sm:$0xff]  ;;  %v620_v48 = vld [vmem:[#allocation8] sm:$0xff] }
  0x1f   :  { %v639_v50 = vld [vmem:[%s853_s4 + $0x1] ss:$0 sm:$0xff]  ;;  %v640_v57 = vld [vmem:[%s855_s6] ss:$0 sm:$0xff]  ;;  %s779_s4 = smov [#allocation10]   ;;  %s781_s6 = smov 8  }
  0x20   :  { %169 = vmatpush.bf16.msra.mxu0 %v600_v6  ;;  %s445_s26 = sshll.u32 %s779_s4, 4  ;;  %s446_s26 = int_to_ptr.vmem [resolvable:$true] %s445_s26 }
  0x21   :  { %254 = vmatpush.bf16.msra.mxu1 %v608_v7  ;;  %424 = vmatpush.bf16.msra.mxu3 %v626_v34 }
  0x22   :  { %340 = vmatpush.bf16.msra.mxu2 %v617_v19 }
  0x24   :  { %170 = vmatpush.bf16.msra.mxu0 %v599_v8 }
  0x25   :  { %255 = vmatpush.bf16.msra.mxu1 %v607_v13  ;;  %425 = vmatpush.bf16.msra.mxu3 %v625_v35 }
  0x26   :  { %341 = vmatpush.bf16.msra.mxu2 %v616_v20 }
  0x28   :  { %171 = vmatpush.bf16.msra.mxu0 %v598_v9 }
  0x29   :  { %256 = vmatpush.bf16.msra.mxu1 %v606_v14  ;;  %426 = vmatpush.bf16.msra.mxu3 %v624_v36 }
  0x2a   :  { %342 = vmatpush.bf16.msra.mxu2 %v615_v29 }
  0x2c   :  { %172 = vmatpush.bf16.msra.mxu0 %v597_v10 }
  0x2d   :  { %257 = vmatpush.bf16.msra.mxu1 %v605_v15  ;;  %427 = vmatpush.bf16.msra.mxu3 %v623_v45 }
  0x2e   :  { %343 = vmatpush.bf16.msra.mxu2 %v614_v30 }
  0x30   :  { %173 = vmatpush.bf16.msra.mxu0 %v596_v11 }
  0x31   :  { %258 = vmatpush.bf16.msra.mxu1 %v604_v16  ;;  %428 = vmatpush.bf16.msra.mxu3 %v622_v46 }
  0x32   :  { %344 = vmatpush.bf16.msra.mxu2 %v613_v31 }
  0x33   :  { %174 = vmatmul.bf16.vlgmr.msra.gmra.mxu0 %v595_v12 }
  0x35   :  { %429 = vmatpush.bf16.msra.mxu3 %v621_v47 }
  0x36   :  { %345 = vmatpush.bf16.msra.mxu2 %v612_v32 }
  0x39   :  { %430 = vmatpush.bf16.msra.mxu3 %v620_v48 }
  0xb0   :  { %v175_v21 = vpop.f32.mrf.mxu0 }
  0xb1   :  { %v176_v23 = vadd.f32 %v637_v22, %v175_v21 }
  0xb3   :  { %v180_v26 = vmax.f32 %v176_v23, 0.0 }
  0xb8   :  { %v177_v24 = vpop.f32.mrf.mxu0 }
  0xb9   :  { %v178_v25 = vadd.f32 %v637_v22, %v177_v24 }
  0xbb   :  { %v181_v27 = vmax.f32 %v178_v25, 0.0 }
  0xbd   :  { %v182_v28 = vpack.c.bf16 %v181_v27, %v180_v26 }
  0xbf   :  { %259 = vmatmul.bf16.vlgmr.msra.gmra.mxu1 %v182_v28 }
 0x13c   :  { %v260_v37 = vpop.f32.mrf.mxu1 }
 0x13d   :  { %v261_v39 = vadd.f32 %v638_v38, %v260_v37 }
 0x13f   :  { %v265_v42 = vmax.f32 %v261_v39, 0.0 }
 0x144   :  { %v262_v40 = vpop.f32.mrf.mxu1 }
 0x145   :  { %v263_v41 = vadd.f32 %v638_v38, %v262_v40 }
 0x147   :  { %v266_v43 = vmax.f32 %v263_v41, 0.0 }
 0x149   :  { %v267_v44 = vpack.c.bf16 %v266_v43, %v265_v42 }
 0x14b   :  { %346 = vmatmul.bf16.vlgmr.msra.gmra.mxu2 %v267_v44 }
 0x1ce   :  { %v347_v49 = vpop.f32.mrf.mxu2 }
 0x1cf   :  { %v348_v51 = vadd.f32 %v639_v50, %v347_v49 }
 0x1d1   :  { %v352_v54 = vmax.f32 %v348_v51, 0.0 }
 0x1d6   :  { %v349_v52 = vpop.f32.mrf.mxu2 }
 0x1d7   :  { %v350_v53 = vadd.f32 %v639_v50, %v349_v52 }
 0x1d9   :  { %v353_v55 = vmax.f32 %v350_v53, 0.0 }
 0x1db   :  { %v354_v56 = vpack.c.bf16 %v353_v55, %v352_v54 }
 0x1dd   :  { %431 = vmatmul.bf16.vlgmr.msra.gmra.mxu3 %v354_v56 }
 0x260   :  { %v432_v58 = vpop.f32.mrf.mxu3 }
 0x261   :  { %v433_v59 = vadd.f32 %v640_v57, %v432_v58 }
 0x263   :  { %641 = vtanh.f32 %v433_v59 }
 0x268   :  { %v434_v60 = vpop.f32.mrf.mxu3 }
 0x269   :  { %v642_v61 = vpop.eup %641  ;;  %v435_v62 = vadd.f32 %v640_v57, %v434_v60 }
 0x26a   :  { %439 = vst [vmem:[#allocation10] sm:$0xff] %v642_v61 }
 0x26b   :  { %643 = vtanh.f32 %v435_v62 }
 0x271   :  { %v644_v63 = vpop.eup %643 }
 0x272   :  { %440 = vst [vmem:[#allocation10 + $0x8] sm:$0xff] %v644_v63 }
 0x273   :  { %453 = dma.vmem_to_hbm [thread:$0]  %s446_s26, 256, %s448_s29, [#allocation4], %s780_s30, %s780_s30, %s781_s6  }
 0x274   :  { %771 = dma.done.wait [#allocation4], 256  }
 0x275   :  { %772 = vsyncadd [#allocation4], 4294967040 }
 0x276   :  { %458 = vsyncpa [#allocation3], 1 }
 0x277   :  { %459 = vsyncpa [#allocation6], 1 }
 0x278   :  { %460 = vsyncpa [#allocation9], 1 }
 0x279   :  { %461 = vsyncpa [#allocation4], 1 }

// kernel: tpu_custom_call.1
= control target key start
LH: loop header
LB: loop body
LE: loop exit
PB: predicated region body
PF: predicated region fallthrough
CT: control target
= control target key end

     0   :  { %12 = vsyncpa [#allocation3], 0  ;;  %s849_s0 = inlined_call_operand.hbm [shape: bf16[16,128], index: 0, kind: input, shape index: {}]   ;;  %s850_s1 = inlined_call_operand.hbm [shape: bf16[128,128], index: 1, kind: input, shape index: {}]   ;;  %s851_s2 = inlined_call_operand.vmem [shape: f32[1,128], index: 2, kind: input, shape index: {}]   ;;  %s852_s3 = inlined_call_operand.hbm [shape: bf16[2,128,128], index: 3, kind: input, shape index: {}]   ;;  %s853_s4 = inlined_call_operand.vmem [shape: f32[2,1,128], index: 4, kind: input, shape index: {}]   ;;  %s854_s5 = inlined_call_operand.hbm [shape: bf16[128,128], index: 5, kind: input, shape index: {}]   ;;  %s855_s6 = inlined_call_operand.vmem [shape: f32[1,128], index: 6, kind: input, shape index: {}]   ;;  %s856_s7 = inlined_call_operand.hbm [shape: f32[16,128], index: 7, kind: output, shape index: {}]  }
   0x1   :  { %13 = vsyncpa [#allocation6], 0 }
   0x2   :  { %14 = vsyncpa [#allocation9], 0 }
   0x3   :  { %15 = vsyncpa [#allocation4], 0  ;;  %s33_s26 = sshll.u32 %s850_s1, 4  ;;  %s773_s27 = smov [#allocation5]   ;;  %s34_s26 = int_to_ptr.hbm [resolvable:$true] %s33_s26 }
   0x4   :  { %s35_s28 = sshll.u32 %s773_s27, 4  ;;  %s20_s8 = sshll.u32 %s849_s0, 4  ;;  %s36_s28 = int_to_ptr.vmem [resolvable:$true] %s35_s28  ;;  %s21_s8 = int_to_ptr.hbm [resolvable:$true] %s20_s8 }
   0x5   :  { %s774_s9 = smov 64   ;;  %s775_s10 = smov 4  }
   0x6   :  { %41 = dma.hbm_to_vmem [thread:$0]  %s34_s26, 1024, %s36_s28, [#allocation6], %s774_s9, %s774_s9, %s775_s10  }
   0x7   :  { %s776_s11 = smov [#allocation2]   ;;  %s48_s15 = sshll.u32 %s852_s3, 4  ;;  %s49_s15 = int_to_ptr.hbm [resolvable:$true] %s48_s15 }
   0x8   :  { %s22_s12 = sshll.u32 %s776_s11, 4  ;;  %s63_s17 = sshll.u32 %s854_s5, 4  ;;  %s23_s12 = int_to_ptr.vmem [resolvable:$true] %s22_s12  ;;  %s64_s17 = int_to_ptr.hbm [resolvable:$true] %s63_s17 }
   0x9   :  { %28 = dma.hbm_to_vmem [thread:$0]  %s21_s8, 128, %s23_s12, [#allocation3], %s774_s9, %s774_s9, %s775_s10  }
   0xa   :  { %s777_s18 = smov [#allocation7]   ;;  %s778_s0 = smov [#allocation8]  }
   0xb   :  { %s50_s19 = sshll.u32 %s777_s18, 4  ;;  %s65_s20 = sshll.u32 %s778_s0, 4  ;;  %s51_s19 = int_to_ptr.vmem [resolvable:$true] %s50_s19  ;;  %s66_s20 = int_to_ptr.vmem [resolvable:$true] %s65_s20 }
   0xc   :  { %56 = dma.hbm_to_vmem [thread:$0]  %s49_s15, 2048, %s51_s19, [#allocation6], %s774_s9, %s774_s9, %s775_s10  }
   0xd   :  { %71 = dma.hbm_to_vmem [thread:$0]  %s64_s17, 1024, %s66_s20, [#allocation9], %s774_s9, %s774_s9, %s775_s10  }
   0xe   :  { %765 = dma.done.wait [#allocation3], 128  }
   0xf   :  { %766 = vsyncadd [#allocation3], 4294967168 }
  0x10   :  { %767 = dma.done.wait [#allocation6], 3072  }
  0x11   :  { %768 = vsyncadd [#allocation6], 4294964224 }
  0x12   :  { %769 = dma.done.wait [#allocation9], 1024  }
  0x13   :  { %770 = vsyncadd [#allocation9], 4294966272  ;;  %v603_v0 = vld [vmem:[#allocation5 + $0x38] sm:$0xff]  ;;  %v602_v1 = vld [vmem:[#allocation5 + $0x30] sm:$0xff]  ;;  %s447_s29 = sshll.u32 %s856_s7, 4  ;;  %s780_s30 = smov 128   ;;  %s448_s29 = int_to_ptr.hbm [resolvable:$true] %s447_s29 }
  0x14   :  { %166 = vmatpush.bf16.msra.mxu0 %v603_v0  ;;  %v611_v2 = vld [vmem:[#allocation7 + $0x38] sm:$0xff]  ;;  %v610_v3 = vld [vmem:[#allocation7 + $0x30] sm:$0xff]  ;;  %v601_v4 = vld [vmem:[#allocation5 + $0x28] sm:$0xff] }
  0x15   :  { %251 = vmatpush.bf16.msra.mxu1 %v611_v2  ;;  %v609_v5 = vld [vmem:[#allocation7 + $0x28] sm:$0xff]  ;;  %v600_v6 = vld [vmem:[#allocation5 + $0x20] sm:$0xff]  ;;  %v599_v8 = vld [vmem:[#allocation5 + $0x18] sm:$0xff] }
  0x16   :  { %v608_v7 = vld [vmem:[#allocation7 + $0x20] sm:$0xff]  ;;  %v598_v9 = vld [vmem:[#allocation5 + $0x10] sm:$0xff]  ;;  %v597_v10 = vld [vmem:[#allocation5 + $0x8] sm:$0xff] }
  0x17   :  { %v596_v11 = vld [vmem:[#allocation5] sm:$0xff]  ;;  %v595_v12 = vld [vmem:[#allocation2] sm:$0xff]  ;;  %v606_v14 = vld [vmem:[#allocation7 + $0x10] sm:$0xff] }
  0x18   :  { %167 = vmatpush.bf16.msra.mxu0 %v602_v1  ;;  %v607_v13 = vld [vmem:[#allocation7 + $0x18] sm:$0xff]  ;;  %v605_v15 = vld [vmem:[#allocation7 + $0x8] sm:$0xff]  ;;  %v604_v16 = vld [vmem:[#allocation7] sm:$0xff] }
  0x19   :  { %252 = vmatpush.bf16.msra.mxu1 %v610_v3  ;;  %v619_v17 = vld [vmem:[#allocation7 + $0x78] sm:$0xff]  ;;  %v618_v18 = vld [vmem:[#allocation7 + $0x70] sm:$0xff]  ;;  %v617_v19 = vld [vmem:[#allocation7 + $0x68] sm:$0xff] }
  0x1a   :  { %338 = vmatpush.bf16.msra.mxu2 %v619_v17  ;;  %v616_v20 = vld [vmem:[#allocation7 + $0x60] sm:$0xff]  ;;  %v637_v22 = vld [vmem:[%s851_s2] ss:$0 sm:$0xff]  ;;  %v614_v30 = vld [vmem:[#allocation7 + $0x50] sm:$0xff] }
  0x1b   :  { %v615_v29 = vld [vmem:[#allocation7 + $0x58] sm:$0xff]  ;;  %v613_v31 = vld [vmem:[#allocation7 + $0x48] sm:$0xff]  ;;  %v612_v32 = vld [vmem:[#allocation7 + $0x40] sm:$0xff] }
  0x1c   :  { %168 = vmatpush.bf16.msra.mxu0 %v601_v4  ;;  %v627_v33 = vld [vmem:[#allocation8 + $0x38] sm:$0xff]  ;;  %v626_v34 = vld [vmem:[#allocation8 + $0x30] sm:$0xff]  ;;  %v625_v35 = vld [vmem:[#allocation8 + $0x28] sm:$0xff] }
  0x1d   :  { %253 = vmatpush.bf16.msra.mxu1 %v609_v5  ;;  %423 = vmatpush.bf16.msra.mxu3 %v627_v33  ;;  %v624_v36 = vld [vmem:[#allocation8 + $0x20] sm:$0xff]  ;;  %v638_v38 = vld [vmem:[%s853_s4] ss:$0 sm:$0xff]  ;;  %v622_v46 = vld [vmem:[#allocation8 + $0x10] sm:$0xff] }
  0x1e   :  { %339 = vmatpush.bf16.msra.mxu2 %v618_v18  ;;  %v623_v45 = vld [vmem:[#allocation8 + $0x18] sm:$0xff]  ;;  %v621_v47 = vld [vmem:[#allocation8 + $0x8] sm:$0xff]  ;;  %v620_v48 = vld [vmem:[#allocation8] sm:$0xff] }
  0x1f   :  { %v639_v50 = vld [vmem:[%s853_s4 + $0x1] ss:$0 sm:$0xff]  ;;  %v640_v57 = vld [vmem:[%s855_s6] ss:$0 sm:$0xff]  ;;  %s779_s4 = smov [#allocation10]   ;;  %s781_s6 = smov 8  }
  0x20   :  { %169 = vmatpush.bf16.msra.mxu0 %v600_v6  ;;  %s445_s26 = sshll.u32 %s779_s4, 4  ;;  %s446_s26 = int_to_ptr.vmem [resolvable:$true] %s445_s26 }
  0x21   :  { %254 = vmatpush.bf16.msra.mxu1 %v608_v7  ;;  %424 = vmatpush.bf16.msra.mxu3 %v626_v34 }
  0x22   :  { %340 = vmatpush.bf16.msra.mxu2 %v617_v19 }
  0x24   :  { %170 = vmatpush.bf16.msra.mxu0 %v599_v8 }
  0x25   :  { %255 = vmatpush.bf16.msra.mxu1 %v607_v13  ;;  %425 = vmatpush.bf16.msra.mxu3 %v625_v35 }
  0x26   :  { %341 = vmatpush.bf16.msra.mxu2 %v616_v20 }
  0x28   :  { %171 = vmatpush.bf16.msra.mxu0 %v598_v9 }
  0x29   :  { %256 = vmatpush.bf16.msra.mxu1 %v606_v14  ;;  %426 = vmatpush.bf16.msra.mxu3 %v624_v36 }
  0x2a   :  { %342 = vmatpush.bf16.msra.mxu2 %v615_v29 }
  0x2c   :  { %172 = vmatpush.bf16.msra.mxu0 %v597_v10 }
  0x2d   :  { %257 = vmatpush.bf16.msra.mxu1 %v605_v15  ;;  %427 = vmatpush.bf16.msra.mxu3 %v623_v45 }
  0x2e   :  { %343 = vmatpush.bf16.msra.mxu2 %v614_v30 }
  0x30   :  { %173 = vmatpush.bf16.msra.mxu0 %v596_v11 }
  0x31   :  { %258 = vmatpush.bf16.msra.mxu1 %v604_v16  ;;  %428 = vmatpush.bf16.msra.mxu3 %v622_v46 }
  0x32   :  { %344 = vmatpush.bf16.msra.mxu2 %v613_v31 }
  0x33   :  { %174 = vmatmul.bf16.vlgmr.msra.gmra.mxu0 %v595_v12 }
  0x35   :  { %429 = vmatpush.bf16.msra.mxu3 %v621_v47 }
  0x36   :  { %345 = vmatpush.bf16.msra.mxu2 %v612_v32 }
  0x39   :  { %430 = vmatpush.bf16.msra.mxu3 %v620_v48 }
  0xb0   :  { %v175_v21 = vpop.f32.mrf.mxu0 }
  0xb1   :  { %v176_v23 = vadd.f32 %v637_v22, %v175_v21 }
  0xb3   :  { %v180_v26 = vmax.f32 %v176_v23, 0.0 }
  0xb8   :  { %v177_v24 = vpop.f32.mrf.mxu0 }
  0xb9   :  { %v178_v25 = vadd.f32 %v637_v22, %v177_v24 }
  0xbb   :  { %v181_v27 = vmax.f32 %v178_v25, 0.0 }
  0xbd   :  { %v182_v28 = vpack.c.bf16 %v181_v27, %v180_v26 }
  0xbf   :  { %259 = vmatmul.bf16.vlgmr.msra.gmra.mxu1 %v182_v28 }
 0x13c   :  { %v260_v37 = vpop.f32.mrf.mxu1 }
 0x13d   :  { %v261_v39 = vadd.f32 %v638_v38, %v260_v37 }
 0x13f   :  { %v265_v42 = vmax.f32 %v261_v39, 0.0 }
 0x144   :  { %v262_v40 = vpop.f32.mrf.mxu1 }
 0x145   :  { %v263_v41 = vadd.f32 %v638_v38, %v262_v40 }
 0x147   :  { %v266_v43 = vmax.f32 %v263_v41, 0.0 }
 0x149   :  { %v267_v44 = vpack.c.bf16 %v266_v43, %v265_v42 }
 0x14b   :  { %346 = vmatmul.bf16.vlgmr.msra.gmra.mxu2 %v267_v44 }
 0x1ce   :  { %v347_v49 = vpop.f32.mrf.mxu2 }
 0x1cf   :  { %v348_v51 = vadd.f32 %v639_v50, %v347_v49 }
 0x1d1   :  { %v352_v54 = vmax.f32 %v348_v51, 0.0 }
 0x1d6   :  { %v349_v52 = vpop.f32.mrf.mxu2 }
 0x1d7   :  { %v350_v53 = vadd.f32 %v639_v50, %v349_v52 }
 0x1d9   :  { %v353_v55 = vmax.f32 %v350_v53, 0.0 }
 0x1db   :  { %v354_v56 = vpack.c.bf16 %v353_v55, %v352_v54 }
 0x1dd   :  { %431 = vmatmul.bf16.vlgmr.msra.gmra.mxu3 %v354_v56 }
 0x260   :  { %v432_v58 = vpop.f32.mrf.mxu3 }
 0x261   :  { %v433_v59 = vadd.f32 %v640_v57, %v432_v58 }
 0x263   :  { %641 = vtanh.f32 %v433_v59 }
 0x268   :  { %v434_v60 = vpop.f32.mrf.mxu3 }
 0x269   :  { %v642_v61 = vpop.eup %641  ;;  %v435_v62 = vadd.f32 %v640_v57, %v434_v60 }
 0x26a   :  { %439 = vst [vmem:[#allocation10] sm:$0xff] %v642_v61 }
 0x26b   :  { %643 = vtanh.f32 %v435_v62 }
 0x271   :  { %v644_v63 = vpop.eup %643 }
 0x272   :  { %440 = vst [vmem:[#allocation10 + $0x8] sm:$0xff] %v644_v63 }
 0x273   :  { %453 = dma.vmem_to_hbm [thread:$0]  %s446_s26, 256, %s448_s29, [#allocation4], %s780_s30, %s780_s30, %s781_s6  }
 0x274   :  { %771 = dma.done.wait [#allocation4], 256  }
 0x275   :  { %772 = vsyncadd [#allocation4], 4294967040 }
 0x276   :  { %458 = vsyncpa [#allocation3], 1 }
 0x277   :  { %459 = vsyncpa [#allocation6], 1 }
 0x278   :  { %460 = vsyncpa [#allocation9], 1 }
 0x279   :  { %461 = vsyncpa [#allocation4], 1 }

</bundles_post_ra>
